<compile_context>
chip_gen: v7x
topology: tpu7x:2x2x1
jax: 0.10.0
libtpu: 0.0.40
codegen_flags: <defaults>
</compile_context>

<pallas_src>
import functools

import numpy as np
import jax
import jax.numpy as jnp
from jax import lax
from jax.experimental import pallas as pl
from jax.experimental.pallas import tpu as pltpu


# ----------------------------------------------------------------------------- kernel
def _conv_block_kernel(x_ref, w_ref, b_ref, g_ref, beta_ref, mask_ref, sel_ref,
                       o_ref,
                       conv_ref, sum_ref, sq_ref, scale_ref, shift_ref,
                       *, H, W, N, eps):
    # x_ref    : (1, Cin, H*W)   one batch element (channels on sublanes, spatial on lanes)
    # w_ref    : (9, Cout, Cin)  3x3 taps, tap = ky*3 + kx
    # b_ref    : (Cout, 1)       conv bias
    # g_ref, beta_ref : (Cout, 1) BN gamma / beta
    # mask_ref : (9, 1, H*W)     per-tap zero-padding masks (static constants)
    # sel_ref  : (H*W, Hh*Wh)    0/1 selector gathering the 2x2 pool anchors
    # o_ref    : (1, Cout, Hh*Wh) pooled output
    # conv_ref : (N, Cout, H*W)  VMEM-resident conv activations (persist across grid steps)
    # sum_ref, sq_ref, scale_ref, shift_ref : (Cout, 1) BN statistics / fused affine
    phase = pl.program_id(0)          # 0: conv+bias+stats   1: BN+ReLU+pool
    n = pl.program_id(1)              # batch element
    HW = H * W
    Cout = conv_ref.shape[1]

    @pl.when(phase == 0)
    def _conv_phase():
        @pl.when(n == 0)
        def _init_stats():
            sum_ref[...] = jnp.zeros_like(sum_ref)
            sq_ref[...] = jnp.zeros_like(sq_ref)

        x = x_ref[0]                                       # (Cin, HW)
        acc = jnp.zeros((Cout, HW), jnp.float32)
        for ky in range(3):                                # static unrolled 3x3 taps
            for kx in range(3):
                t = ky * 3 + kx
                off = (ky - 1) * W + (kx - 1)
                # tap shift: lane rotation (XLU slot), shifted[p] = x[p + off]
                tap = x if off == 0 else pltpu.roll(x, shift=(-off) % HW, axis=1)
                if off != 0:
                    tap = tap * mask_ref[t]                # zero-padding of the conv
                acc = acc + jnp.dot(w_ref[t], tap,
                                    preferred_element_type=jnp.float32)
        acc = acc + b_ref[...]                             # (Cout,1) bias, lane-broadcast
        conv_ref[n] = acc                                  # stays in VMEM (no HBM round-trip)
        # fused BN batch statistics, accumulated across the batch in scratch
        sum_ref[...] += jnp.sum(acc, axis=1, keepdims=True)
        sq_ref[...] += jnp.sum(acc * acc, axis=1, keepdims=True)

    @pl.when(phase == 1)
    def _bn_pool_phase():
        @pl.when(n == 0)
        def _finalize_stats():
            inv_count = 1.0 / float(N * HW)
            mean = sum_ref[...] * inv_count
            var = jnp.maximum(sq_ref[...] * inv_count - mean * mean, 0.0)  # biased var
            scale = g_ref[...] * lax.rsqrt(var + eps)
            scale_ref[...] = scale
            shift_ref[...] = beta_ref[...] - mean * scale

        z = conv_ref[n] * scale_ref[...] + shift_ref[...]          # BN affine
        z = jnp.maximum(z, 0.0)                                    # ReLU
        # 2x2 max pool: horizontal pair (lane p, p+1), then vertical pair (p, p+W)
        zh = jnp.maximum(z, pltpu.roll(z, shift=HW - 1, axis=1))
        zv = jnp.maximum(zh, pltpu.roll(zh, shift=HW - W, axis=1))
        # gather the even-(y,x) anchors into the pooled layout with one small MXU matmul
        o_ref[0] = jnp.dot(zv, sel_ref[...], preferred_element_type=jnp.float32)


# ----------------------------------------------------------------------------- wrapper
def conv_block_forward(x_nchw, w_oihw, b, gamma, beta, eps=1e-5):
    """ConvBlock forward. x_nchw: (N, Cin, H, W) float32 -> (N, Cout, H//2, W//2)."""
    N, Cin, H, W = x_nchw.shape
    Cout = w_oihw.shape[0]
    HW = H * W
    Hh, Wh = H // 2, W // 2
    HWp = Hh * Wh

    # metadata reshapes only (no pad / no transpose of x)
    x_flat = x_nchw.reshape(N, Cin, HW).astype(jnp.float32)
    w9 = jnp.transpose(w_oihw.astype(jnp.float32), (2, 3, 0, 1)).reshape(9, Cout, Cin)
    b2 = b.reshape(Cout, 1).astype(jnp.float32)
    g2 = gamma.reshape(Cout, 1).astype(jnp.float32)
    be2 = beta.reshape(Cout, 1).astype(jnp.float32)

    # static constants built with numpy at trace time (no runtime XLA ops)
    pos = np.arange(HW)
    yy, xx = pos // W, pos % W
    masks = np.empty((9, 1, HW), np.float32)
    for ky in range(3):
        for kx in range(3):
            oy, ox = ky - 1, kx - 1
            ok = (yy + oy >= 0) & (yy + oy < H) & (xx + ox >= 0) & (xx + ox < W)
            masks[ky * 3 + kx, 0] = ok.astype(np.float32)
    q = np.arange(HWp)
    anchors = (q // Wh) * (2 * W) + (q % Wh) * 2
    sel = (pos[:, None] == anchors[None, :]).astype(np.float32)          # (HW, Hh*Wh)

    pooled = pl.pallas_call(
        functools.partial(_conv_block_kernel, H=H, W=W, N=N, eps=float(eps)),
        out_shape=jax.ShapeDtypeStruct((N, Cout, HWp), jnp.float32),
        grid_spec=pltpu.PrefetchScalarGridSpec(
            num_scalar_prefetch=0,
            grid=(2, N),                               # (phase, batch) -- phase outermost
            in_specs=[
                pl.BlockSpec((1, Cin, HW), lambda p, n: (n, 0, 0)),
                pl.BlockSpec((9, Cout, Cin), lambda p, n: (0, 0, 0)),
                pl.BlockSpec((Cout, 1), lambda p, n: (0, 0)),
                pl.BlockSpec((Cout, 1), lambda p, n: (0, 0)),
                pl.BlockSpec((Cout, 1), lambda p, n: (0, 0)),
                pl.BlockSpec((9, 1, HW), lambda p, n: (0, 0, 0)),
                pl.BlockSpec((HW, HWp), lambda p, n: (0, 0)),
            ],
            # phase 0 never writes the output; pin its block index to 0 there so the
            # only HBM writebacks are the correct phase-1 blocks.
            out_specs=pl.BlockSpec((1, Cout, HWp), lambda p, n: (n * p, 0, 0)),
            scratch_shapes=[
                pltpu.VMEM((N, Cout, HW), jnp.float32),   # conv activations (16 KiB here)
                pltpu.VMEM((Cout, 1), jnp.float32),       # sum
                pltpu.VMEM((Cout, 1), jnp.float32),       # sum of squares
                pltpu.VMEM((Cout, 1), jnp.float32),       # fused BN scale
                pltpu.VMEM((Cout, 1), jnp.float32),       # fused BN shift
            ]),
        # cross-batch stat accumulation in scratch -> both axes must stay sequential
        compiler_params=pltpu.CompilerParams(
            dimension_semantics=("arbitrary", "arbitrary")),
    )(x_flat, w9, b2, g2, be2, jnp.asarray(masks), jnp.asarray(sel))

    return pooled.reshape(N, Cout, Hh, Wh)                               # NCHW, free reshape


# ----------------------------------------------------------------------------- reference
def conv_block_reference(x_nchw, w_oihw, b, gamma, beta, eps=1e-5):
    conv = lax.conv_general_dilated(
        x_nchw, w_oihw, window_strides=(1, 1), padding="SAME",
        dimension_numbers=("NCHW", "OIHW", "NCHW")) + b.reshape(1, -1, 1, 1)
    mean = conv.mean(axis=(0, 2, 3))
    var = conv.var(axis=(0, 2, 3))            # biased, matches BN normalization
    norm = (conv - mean[None, :, None, None]) / jnp.sqrt(var + eps)[None, :, None, None]
    norm = norm * gamma[None, :, None, None] + beta[None, :, None, None]
    act = jnp.maximum(norm, 0.0)
    N, C, H, W = act.shape
    return act.reshape(N, C, H // 2, 2, W // 2, 2).max(axis=(3, 5))


# ----------------------------------------------------------------------------- main
if __name__ == "__main__":
    N, Cin, H, W = 2, 4, 16, 16
    Cout = 8

    key = jax.random.PRNGKey(0)
    kx, kw, kb, kg, kbe = jax.random.split(key, 5)

    x = jax.random.normal(kx, (N, Cin, H, W), dtype=jnp.float32)
    # PyTorch Conv2d weight shape: (Cout, Cin, 3, 3)
    w = jax.random.normal(kw, (Cout, Cin, 3, 3), dtype=jnp.float32) * 0.1
    b = jax.random.normal(kb, (Cout,), dtype=jnp.float32) * 0.1
    gamma = 1.0 + 0.1 * jax.random.normal(kg, (Cout,), dtype=jnp.float32)  # BN weight
    beta = 0.1 * jax.random.normal(kbe, (Cout,), dtype=jnp.float32)        # BN bias

    fwd = jax.jit(conv_block_forward)
    out = jax.block_until_ready(fwd(x, w, b, gamma, beta))
    ref = jax.block_until_ready(conv_block_reference(x, w, b, gamma, beta))

    assert out.shape == (N, Cout, H // 2, W // 2), out.shape
    assert jnp.allclose(out, ref, atol=1e-3, rtol=1e-3), float(jnp.max(jnp.abs(out - ref)))

    # TODO(synk): BatchNorm2d running_mean/running_var buffer updates (module state) are not
    # materialized; training-mode forward output only depends on batch stats, which we use.
    print("KERNEL_OK")
</pallas_src>

<mosaic_0001>
module attributes {stable_mosaic.version = 11 : i64} {
  func.func @_conv_block_kernel(%arg0: i32, %arg1: i32, %arg2: memref<1x4x256xf32, #tpu.memory_space<vmem>>, %arg3: memref<9x8x4xf32, #tpu.memory_space<vmem>>, %arg4: memref<8x1xf32, #tpu.memory_space<vmem>>, %arg5: memref<8x1xf32, #tpu.memory_space<vmem>>, %arg6: memref<8x1xf32, #tpu.memory_space<vmem>>, %arg7: memref<9x1x256xf32, #tpu.memory_space<vmem>>, %arg8: memref<256x64xf32, #tpu.memory_space<vmem>>, %arg9: memref<1x8x64xf32, #tpu.memory_space<vmem>>, %arg10: memref<2x8x256xf32, #tpu.memory_space<vmem>>, %arg11: memref<8x1xf32, #tpu.memory_space<vmem>>, %arg12: memref<8x1xf32, #tpu.memory_space<vmem>>, %arg13: memref<8x1xf32, #tpu.memory_space<vmem>>, %arg14: memref<8x1xf32, #tpu.memory_space<vmem>>) attributes {dimension_semantics = [#tpu.dimension_semantics<arbitrary>, #tpu.dimension_semantics<arbitrary>], iteration_bounds = array<i64: 2, 2>, scalar_prefetch = 0 : i64, scratch_operands = 5 : i64, tpu.core_type = #tpu.core_type<tc>, window_params = [{transform_indices = @transform_0, window_bounds = array<i64: 1, 4, 256>}, {pipeline_mode = #tpu.pipeline_mode<synchronous>, transform_indices = @transform_1, window_bounds = array<i64: 9, 8, 4>}, {pipeline_mode = #tpu.pipeline_mode<synchronous>, transform_indices = @transform_2, window_bounds = array<i64: 8, 1>}, {pipeline_mode = #tpu.pipeline_mode<synchronous>, transform_indices = @transform_3, window_bounds = array<i64: 8, 1>}, {pipeline_mode = #tpu.pipeline_mode<synchronous>, transform_indices = @transform_4, window_bounds = array<i64: 8, 1>}, {pipeline_mode = #tpu.pipeline_mode<synchronous>, transform_indices = @transform_5, window_bounds = array<i64: 9, 1, 256>}, {pipeline_mode = #tpu.pipeline_mode<synchronous>, transform_indices = @transform_6, window_bounds = array<i64: 256, 64>}, {transform_indices = @transform_7, window_bounds = array<i64: 1, 8, 64>}]} {
    %c0_i32 = arith.constant 0 : i32
    %0 = arith.cmpi eq, %arg0, %c0_i32 : i32
    %1 = arith.extui %0 : i1 to i32
    %c0_i32_0 = arith.constant 0 : i32
    %2 = arith.cmpi ne, %1, %c0_i32_0 : i32
    scf.if %2 {
      %c0_i32_2 = arith.constant 0 : i32
      %6 = arith.cmpi eq, %arg1, %c0_i32_2 : i32
      %7 = arith.extui %6 : i1 to i32
      %c0_i32_3 = arith.constant 0 : i32
      %8 = arith.cmpi ne, %7, %c0_i32_3 : i32
      scf.if %8 {
        %cst_73 = arith.constant 0.000000e+00 : f32
        %106 = vector.broadcast %cst_73 : f32 to vector<8x1xf32>
        %c0_74 = arith.constant 0 : index
        %c0_75 = arith.constant 0 : index
        %107 = vector.load %arg11[%c0_74, %c0_75] : memref<8x1xf32, #tpu.memory_space<vmem>>, vector<8x1xf32>
        tpu.vector_store %arg11[%c0_74, %c0_75], %106 {strides = array<i32>} : memref<8x1xf32, #tpu.memory_space<vmem>>, vector<8x1xf32>,
        %cst_76 = arith.constant 0.000000e+00 : f32
        %108 = vector.broadcast %cst_76 : f32 to vector<8x1xf32>
        %c0_77 = arith.constant 0 : index
        %c0_78 = arith.constant 0 : index
        %109 = vector.load %arg12[%c0_77, %c0_78] : memref<8x1xf32, #tpu.memory_space<vmem>>, vector<8x1xf32>
        tpu.vector_store %arg12[%c0_77, %c0_78], %108 {strides = array<i32>} : memref<8x1xf32, #tpu.memory_space<vmem>>, vector<8x1xf32>,
      } else {
      }
      %c0 = arith.constant 0 : index
      %c0_4 = arith.constant 0 : index
      %c0_5 = arith.constant 0 : index
      %9 = vector.load %arg2[%c0, %c0_4, %c0_5] : memref<1x4x256xf32, #tpu.memory_space<vmem>>, vector<1x4x256xf32>
      %10 = vector.shape_cast %9 : vector<1x4x256xf32> to vector<4x256xf32>
      %cst = arith.constant 0.000000e+00 : f32
      %11 = vector.broadcast %cst : f32 to vector<8x256xf32>
      %c17_i32 = arith.constant 17 : i32
      %12 = tpu.dynamic_rotate %10 by %c17_i32 dim 1 : vector<4x256xf32>, i32 -> vector<4x256xf32>
      %c0_6 = arith.constant 0 : index
      %c0_7 = arith.constant 0 : index
      %c0_8 = arith.constant 0 : index
      %13 = vector.load %arg7[%c0_6, %c0_7, %c0_8] : memref<9x1x256xf32, #tpu.memory_space<vmem>>, vector<1x1x256xf32>
      %14 = vector.shape_cast %13 : vector<1x1x256xf32> to vector<1x256xf32>
      %15 = vector.broadcast %14 : vector<1x256xf32> to vector<4x256xf32>
      %16 = arith.mulf %12, %15 : vector<4x256xf32>
      %c0_9 = arith.constant 0 : index
      %c0_10 = arith.constant 0 : index
      %c0_11 = arith.constant 0 : index
      %17 = vector.load %arg3[%c0_9, %c0_10, %c0_11] : memref<9x8x4xf32, #tpu.memory_space<vmem>>, vector<1x8x4xf32>
      %18 = vector.shape_cast %17 : vector<1x8x4xf32> to vector<8x4xf32>
      %cst_12 = arith.constant dense<0.000000e+00> : vector<8x256xf32>
      %19 = tpu.matmul %18, %16, %cst_12 {dimension_numbers = #tpu.dot_dimension_numbers<[1], [0], [0], [1], [0, 0, 1, 1], [], []>} : vector<8x4xf32>, vector<4x256xf32>, vector<8x256xf32> -> vector<8x256xf32>
      %20 = arith.addf %11, %19 : vector<8x256xf32>
      %c16_i32 = arith.constant 16 : i32
      %21 = tpu.dynamic_rotate %10 by %c16_i32 dim 1 : vector<4x256xf32>, i32 -> vector<4x256xf32>
      %c1 = arith.constant 1 : index
      %c0_13 = arith.constant 0 : index
      %c0_14 = arith.constant 0 : index
      %22 = vector.load %arg7[%c1, %c0_13, %c0_14] : memref<9x1x256xf32, #tpu.memory_space<vmem>>, vector<1x1x256xf32>
      %23 = vector.shape_cast %22 : vector<1x1x256xf32> to vector<1x256xf32>
      %24 = vector.broadcast %23 : vector<1x256xf32> to vector<4x256xf32>
      %25 = arith.mulf %21, %24 : vector<4x256xf32>
      %c1_15 = arith.constant 1 : index
      %c0_16 = arith.constant 0 : index
      %c0_17 = arith.constant 0 : index
      %26 = vector.load %arg3[%c1_15, %c0_16, %c0_17] : memref<9x8x4xf32, #tpu.memory_space<vmem>>, vector<1x8x4xf32>
      %27 = vector.shape_cast %26 : vector<1x8x4xf32> to vector<8x4xf32>
      %cst_18 = arith.constant dense<0.000000e+00> : vector<8x256xf32>
      %28 = tpu.matmul %27, %25, %cst_18 {dimension_numbers = #tpu.dot_dimension_numbers<[1], [0], [0], [1], [0, 0, 1, 1], [], []>} : vector<8x4xf32>, vector<4x256xf32>, vector<8x256xf32> -> vector<8x256xf32>
      %29 = arith.addf %20, %28 : vector<8x256xf32>
      %c15_i32 = arith.constant 15 : i32
      %30 = tpu.dynamic_rotate %10 by %c15_i32 dim 1 : vector<4x256xf32>, i32 -> vector<4x256xf32>
      %c2 = arith.constant 2 : index
      %c0_19 = arith.constant 0 : index
      %c0_20 = arith.constant 0 : index
      %31 = vector.load %arg7[%c2, %c0_19, %c0_20] : memref<9x1x256xf32, #tpu.memory_space<vmem>>, vector<1x1x256xf32>
      %32 = vector.shape_cast %31 : vector<1x1x256xf32> to vector<1x256xf32>
      %33 = vector.broadcast %32 : vector<1x256xf32> to vector<4x256xf32>
      %34 = arith.mulf %30, %33 : vector<4x256xf32>
      %c2_21 = arith.constant 2 : index
      %c0_22 = arith.constant 0 : index
      %c0_23 = arith.constant 0 : index
      %35 = vector.load %arg3[%c2_21, %c0_22, %c0_23] : memref<9x8x4xf32, #tpu.memory_space<vmem>>, vector<1x8x4xf32>
      %36 = vector.shape_cast %35 : vector<1x8x4xf32> to vector<8x4xf32>
      %cst_24 = arith.constant dense<0.000000e+00> : vector<8x256xf32>
      %37 = tpu.matmul %36, %34, %cst_24 {dimension_numbers = #tpu.dot_dimension_numbers<[1], [0], [0], [1], [0, 0, 1, 1], [], []>} : vector<8x4xf32>, vector<4x256xf32>, vector<8x256xf32> -> vector<8x256xf32>
      %38 = arith.addf %29, %37 : vector<8x256xf32>
      %c1_i32_25 = arith.constant 1 : i32
      %39 = tpu.dynamic_rotate %10 by %c1_i32_25 dim 1 : vector<4x256xf32>, i32 -> vector<4x256xf32>
      %c3 = arith.constant 3 : index
      %c0_26 = arith.constant 0 : index
      %c0_27 = arith.constant 0 : index
      %40 = vector.load %arg7[%c3, %c0_26, %c0_27] : memref<9x1x256xf32, #tpu.memory_space<vmem>>, vector<1x1x256xf32>
      %41 = vector.shape_cast %40 : vector<1x1x256xf32> to vector<1x256xf32>
      %42 = vector.broadcast %41 : vector<1x256xf32> to vector<4x256xf32>
      %43 = arith.mulf %39, %42 : vector<4x256xf32>
      %c3_28 = arith.constant 3 : index
      %c0_29 = arith.constant 0 : index
      %c0_30 = arith.constant 0 : index
      %44 = vector.load %arg3[%c3_28, %c0_29, %c0_30] : memref<9x8x4xf32, #tpu.memory_space<vmem>>, vector<1x8x4xf32>
      %45 = vector.shape_cast %44 : vector<1x8x4xf32> to vector<8x4xf32>
      %cst_31 = arith.constant dense<0.000000e+00> : vector<8x256xf32>
      %46 = tpu.matmul %45, %43, %cst_31 {dimension_numbers = #tpu.dot_dimension_numbers<[1], [0], [0], [1], [0, 0, 1, 1], [], []>} : vector<8x4xf32>, vector<4x256xf32>, vector<8x256xf32> -> vector<8x256xf32>
      %47 = arith.addf %38, %46 : vector<8x256xf32>
      %c4 = arith.constant 4 : index
      %c0_32 = arith.constant 0 : index
      %c0_33 = arith.constant 0 : index
      %48 = vector.load %arg3[%c4, %c0_32, %c0_33] : memref<9x8x4xf32, #tpu.memory_space<vmem>>, vector<1x8x4xf32>
      %49 = vector.shape_cast %48 : vector<1x8x4xf32> to vector<8x4xf32>
      %cst_34 = arith.constant dense<0.000000e+00> : vector<8x256xf32>
      %50 = tpu.matmul %49, %10, %cst_34 {dimension_numbers = #tpu.dot_dimension_numbers<[1], [0], [0], [1], [0, 0, 1, 1], [], []>} : vector<8x4xf32>, vector<4x256xf32>, vector<8x256xf32> -> vector<8x256xf32>
      %51 = arith.addf %47, %50 : vector<8x256xf32>
      %c255_i32 = arith.constant 255 : i32
      %52 = tpu.dynamic_rotate %10 by %c255_i32 dim 1 : vector<4x256xf32>, i32 -> vector<4x256xf32>
      %c5 = arith.constant 5 : index
      %c0_35 = arith.constant 0 : index
      %c0_36 = arith.constant 0 : index
      %53 = vector.load %arg7[%c5, %c0_35, %c0_36] : memref<9x1x256xf32, #tpu.memory_space<vmem>>, vector<1x1x256xf32>
      %54 = vector.shape_cast %53 : vector<1x1x256xf32> to vector<1x256xf32>
      %55 = vector.broadcast %54 : vector<1x256xf32> to vector<4x256xf32>
      %56 = arith.mulf %52, %55 : vector<4x256xf32>
      %c5_37 = arith.constant 5 : index
      %c0_38 = arith.constant 0 : index
      %c0_39 = arith.constant 0 : index
      %57 = vector.load %arg3[%c5_37, %c0_38, %c0_39] : memref<9x8x4xf32, #tpu.memory_space<vmem>>, vector<1x8x4xf32>
      %58 = vector.shape_cast %57 : vector<1x8x4xf32> to vector<8x4xf32>
      %cst_40 = arith.constant dense<0.000000e+00> : vector<8x256xf32>
      %59 = tpu.matmul %58, %56, %cst_40 {dimension_numbers = #tpu.dot_dimension_numbers<[1], [0], [0], [1], [0, 0, 1, 1], [], []>} : vector<8x4xf32>, vector<4x256xf32>, vector<8x256xf32> -> vector<8x256xf32>
      %60 = arith.addf %51, %59 : vector<8x256xf32>
      %c241_i32 = arith.constant 241 : i32
      %61 = tpu.dynamic_rotate %10 by %c241_i32 dim 1 : vector<4x256xf32>, i32 -> vector<4x256xf32>
      %c6 = arith.constant 6 : index
      %c0_41 = arith.constant 0 : index
      %c0_42 = arith.constant 0 : index
      %62 = vector.load %arg7[%c6, %c0_41, %c0_42] : memref<9x1x256xf32, #tpu.memory_space<vmem>>, vector<1x1x256xf32>
      %63 = vector.shape_cast %62 : vector<1x1x256xf32> to vector<1x256xf32>
      %64 = vector.broadcast %63 : vector<1x256xf32> to vector<4x256xf32>
      %65 = arith.mulf %61, %64 : vector<4x256xf32>
      %c6_43 = arith.constant 6 : index
      %c0_44 = arith.constant 0 : index
      %c0_45 = arith.constant 0 : index
      %66 = vector.load %arg3[%c6_43, %c0_44, %c0_45] : memref<9x8x4xf32, #tpu.memory_space<vmem>>, vector<1x8x4xf32>
      %67 = vector.shape_cast %66 : vector<1x8x4xf32> to vector<8x4xf32>
      %cst_46 = arith.constant dense<0.000000e+00> : vector<8x256xf32>
      %68 = tpu.matmul %67, %65, %cst_46 {dimension_numbers = #tpu.dot_dimension_numbers<[1], [0], [0], [1], [0, 0, 1, 1], [], []>} : vector<8x4xf32>, vector<4x256xf32>, vector<8x256xf32> -> vector<8x256xf32>
      %69 = arith.addf %60, %68 : vector<8x256xf32>
      %c240_i32 = arith.constant 240 : i32
      %70 = tpu.dynamic_rotate %10 by %c240_i32 dim 1 : vector<4x256xf32>, i32 -> vector<4x256xf32>
      %c7 = arith.constant 7 : index
      %c0_47 = arith.constant 0 : index
      %c0_48 = arith.constant 0 : index
      %71 = vector.load %arg7[%c7, %c0_47, %c0_48] : memref<9x1x256xf32, #tpu.memory_space<vmem>>, vector<1x1x256xf32>
      %72 = vector.shape_cast %71 : vector<1x1x256xf32> to vector<1x256xf32>
      %73 = vector.broadcast %72 : vector<1x256xf32> to vector<4x256xf32>
      %74 = arith.mulf %70, %73 : vector<4x256xf32>
      %c7_49 = arith.constant 7 : index
      %c0_50 = arith.constant 0 : index
      %c0_51 = arith.constant 0 : index
      %75 = vector.load %arg3[%c7_49, %c0_50, %c0_51] : memref<9x8x4xf32, #tpu.memory_space<vmem>>, vector<1x8x4xf32>
      %76 = vector.shape_cast %75 : vector<1x8x4xf32> to vector<8x4xf32>
      %cst_52 = arith.constant dense<0.000000e+00> : vector<8x256xf32>
      %77 = tpu.matmul %76, %74, %cst_52 {dimension_numbers = #tpu.dot_dimension_numbers<[1], [0], [0], [1], [0, 0, 1, 1], [], []>} : vector<8x4xf32>, vector<4x256xf32>, vector<8x256xf32> -> vector<8x256xf32>
      %78 = arith.addf %69, %77 : vector<8x256xf32>
      %c239_i32 = arith.constant 239 : i32
      %79 = tpu.dynamic_rotate %10 by %c239_i32 dim 1 : vector<4x256xf32>, i32 -> vector<4x256xf32>
      %c8 = arith.constant 8 : index
      %c0_53 = arith.constant 0 : index
      %c0_54 = arith.constant 0 : index
      %80 = vector.load %arg7[%c8, %c0_53, %c0_54] : memref<9x1x256xf32, #tpu.memory_space<vmem>>, vector<1x1x256xf32>
      %81 = vector.shape_cast %80 : vector<1x1x256xf32> to vector<1x256xf32>
      %82 = vector.broadcast %81 : vector<1x256xf32> to vector<4x256xf32>
      %83 = arith.mulf %79, %82 : vector<4x256xf32>
      %c8_55 = arith.constant 8 : index
      %c0_56 = arith.constant 0 : index
      %c0_57 = arith.constant 0 : index
      %84 = vector.load %arg3[%c8_55, %c0_56, %c0_57] : memref<9x8x4xf32, #tpu.memory_space<vmem>>, vector<1x8x4xf32>
      %85 = vector.shape_cast %84 : vector<1x8x4xf32> to vector<8x4xf32>
      %cst_58 = arith.constant dense<0.000000e+00> : vector<8x256xf32>
      %86 = tpu.matmul %85, %83, %cst_58 {dimension_numbers = #tpu.dot_dimension_numbers<[1], [0], [0], [1], [0, 0, 1, 1], [], []>} : vector<8x4xf32>, vector<4x256xf32>, vector<8x256xf32> -> vector<8x256xf32>
      %87 = arith.addf %78, %86 : vector<8x256xf32>
      %c0_59 = arith.constant 0 : index
      %c0_60 = arith.constant 0 : index
      %88 = vector.load %arg4[%c0_59, %c0_60] : memref<8x1xf32, #tpu.memory_space<vmem>>, vector<8x1xf32>
      %89 = vector.broadcast %88 : vector<8x1xf32> to vector<8x256xf32>
      %90 = arith.addf %87, %89 : vector<8x256xf32>
      %91 = arith.index_cast %arg1 : i32 to index
      %c0_61 = arith.constant 0 : index
      %c0_62 = arith.constant 0 : index
      %92 = vector.load %arg10[%91, %c0_61, %c0_62] : memref<2x8x256xf32, #tpu.memory_space<vmem>>, vector<1x8x256xf32>
      %93 = vector.shape_cast %92 : vector<1x8x256xf32> to vector<8x256xf32>
      %94 = vector.shape_cast %90 : vector<8x256xf32> to vector<1x8x256xf32>
      tpu.vector_store %arg10[%91, %c0_61, %c0_62], %94 {strides = array<i32>} : memref<2x8x256xf32, #tpu.memory_space<vmem>>, vector<1x8x256xf32>,
      %c0_63 = arith.constant 0 : index
      %c0_64 = arith.constant 0 : index
      %95 = vector.load %arg11[%c0_63, %c0_64] : memref<8x1xf32, #tpu.memory_space<vmem>>, vector<8x1xf32>
      %cst_65 = arith.constant dense<0.000000e+00> : vector<8xf32>
      %96 = vector.multi_reduction <add>, %90, %cst_65 [1] : vector<8x256xf32> to vector<8xf32>
      %97 = vector.shape_cast %96 : vector<8xf32> to vector<8x1xf32>
      %98 = arith.addf %95, %97 : vector<8x1xf32>
      %c0_66 = arith.constant 0 : index
      %c0_67 = arith.constant 0 : index
      %99 = vector.load %arg11[%c0_66, %c0_67] : memref<8x1xf32, #tpu.memory_space<vmem>>, vector<8x1xf32>
      tpu.vector_store %arg11[%c0_66, %c0_67], %98 {strides = array<i32>} : memref<8x1xf32, #tpu.memory_space<vmem>>, vector<8x1xf32>,
      %c0_68 = arith.constant 0 : index
      %c0_69 = arith.constant 0 : index
      %100 = vector.load %arg12[%c0_68, %c0_69] : memref<8x1xf32, #tpu.memory_space<vmem>>, vector<8x1xf32>
      %101 = arith.mulf %90, %90 : vector<8x256xf32>
      %cst_70 = arith.constant dense<0.000000e+00> : vector<8xf32>
      %102 = vector.multi_reduction <add>, %101, %cst_70 [1] : vector<8x256xf32> to vector<8xf32>
      %103 = vector.shape_cast %102 : vector<8xf32> to vector<8x1xf32>
      %104 = arith.addf %100, %103 : vector<8x1xf32>
      %c0_71 = arith.constant 0 : index
      %c0_72 = arith.constant 0 : index
      %105 = vector.load %arg12[%c0_71, %c0_72] : memref<8x1xf32, #tpu.memory_space<vmem>>, vector<8x1xf32>
      tpu.vector_store %arg12[%c0_71, %c0_72], %104 {strides = array<i32>} : memref<8x1xf32, #tpu.memory_space<vmem>>, vector<8x1xf32>,
    } else {
    }
    %c1_i32 = arith.constant 1 : i32
    %3 = arith.cmpi eq, %arg0, %c1_i32 : i32
    %4 = arith.extui %3 : i1 to i32
    %c0_i32_1 = arith.constant 0 : i32
    %5 = arith.cmpi ne, %4, %c0_i32_1 : i32
    scf.if %5 {
      %c0_i32_2 = arith.constant 0 : i32
      %6 = arith.cmpi eq, %arg1, %c0_i32_2 : i32
      %7 = arith.extui %6 : i1 to i32
      %c0_i32_3 = arith.constant 0 : i32
      %8 = arith.cmpi ne, %7, %c0_i32_3 : i32
      scf.if %8 {
        %c0_15 = arith.constant 0 : index
        %c0_16 = arith.constant 0 : index
        %29 = vector.load %arg11[%c0_15, %c0_16] : memref<8x1xf32, #tpu.memory_space<vmem>>, vector<8x1xf32>
        %cst_17 = arith.constant 0.001953125 : f32
        %30 = vector.broadcast %cst_17 : f32 to vector<8x1xf32>
        %31 = arith.mulf %29, %30 : vector<8x1xf32>
        %c0_18 = arith.constant 0 : index
        %c0_19 = arith.constant 0 : index
        %32 = vector.load %arg12[%c0_18, %c0_19] : memref<8x1xf32, #tpu.memory_space<vmem>>, vector<8x1xf32>
        %cst_20 = arith.constant 0.001953125 : f32
        %33 = vector.broadcast %cst_20 : f32 to vector<8x1xf32>
        %34 = arith.mulf %32, %33 : vector<8x1xf32>
        %35 = arith.mulf %31, %31 : vector<8x1xf32>
        %36 = arith.subf %34, %35 : vector<8x1xf32>
        %cst_21 = arith.constant 0.000000e+00 : f32
        %37 = vector.broadcast %cst_21 : f32 to vector<8x1xf32>
        %38 = arith.maximumf %36, %37 : vector<8x1xf32>
        %c0_22 = arith.constant 0 : index
        %c0_23 = arith.constant 0 : index
        %39 = vector.load %arg5[%c0_22, %c0_23] : memref<8x1xf32, #tpu.memory_space<vmem>>, vector<8x1xf32>
        %cst_24 = arith.constant 9.99999974E-6 : f32
        %40 = vector.broadcast %cst_24 : f32 to vector<8x1xf32>
        %41 = arith.addf %38, %40 : vector<8x1xf32>
        %42 = math.rsqrt %41 : vector<8x1xf32>
        %43 = arith.mulf %39, %42 : vector<8x1xf32>
        %c0_25 = arith.constant 0 : index
        %c0_26 = arith.constant 0 : index
        %44 = vector.load %arg13[%c0_25, %c0_26] : memref<8x1xf32, #tpu.memory_space<vmem>>, vector<8x1xf32>
        tpu.vector_store %arg13[%c0_25, %c0_26], %43 {strides = array<i32>} : memref<8x1xf32, #tpu.memory_space<vmem>>, vector<8x1xf32>,
        %c0_27 = arith.constant 0 : index
        %c0_28 = arith.constant 0 : index
        %45 = vector.load %arg6[%c0_27, %c0_28] : memref<8x1xf32, #tpu.memory_space<vmem>>, vector<8x1xf32>
        %46 = arith.mulf %31, %43 : vector<8x1xf32>
        %47 = arith.subf %45, %46 : vector<8x1xf32>
        %c0_29 = arith.constant 0 : index
        %c0_30 = arith.constant 0 : index
        %48 = vector.load %arg14[%c0_29, %c0_30] : memref<8x1xf32, #tpu.memory_space<vmem>>, vector<8x1xf32>
        tpu.vector_store %arg14[%c0_29, %c0_30], %47 {strides = array<i32>} : memref<8x1xf32, #tpu.memory_space<vmem>>, vector<8x1xf32>,
      } else {
      }
      %9 = arith.index_cast %arg1 : i32 to index
      %c0 = arith.constant 0 : index
      %c0_4 = arith.constant 0 : index
      %10 = vector.load %arg10[%9, %c0, %c0_4] : memref<2x8x256xf32, #tpu.memory_space<vmem>>, vector<1x8x256xf32>
      %11 = vector.shape_cast %10 : vector<1x8x256xf32> to vector<8x256xf32>
      %c0_5 = arith.constant 0 : index
      %c0_6 = arith.constant 0 : index
      %12 = vector.load %arg13[%c0_5, %c0_6] : memref<8x1xf32, #tpu.memory_space<vmem>>, vector<8x1xf32>
      %13 = vector.broadcast %12 : vector<8x1xf32> to vector<8x256xf32>
      %14 = arith.mulf %11, %13 : vector<8x256xf32>
      %c0_7 = arith.constant 0 : index
      %c0_8 = arith.constant 0 : index
      %15 = vector.load %arg14[%c0_7, %c0_8] : memref<8x1xf32, #tpu.memory_space<vmem>>, vector<8x1xf32>
      %16 = vector.broadcast %15 : vector<8x1xf32> to vector<8x256xf32>
      %17 = arith.addf %14, %16 : vector<8x256xf32>
      %cst = arith.constant 0.000000e+00 : f32
      %18 = vector.broadcast %cst : f32 to vector<8x256xf32>
      %19 = arith.maximumf %17, %18 : vector<8x256xf32>
      %c255_i32 = arith.constant 255 : i32
      %20 = tpu.dynamic_rotate %19 by %c255_i32 dim 1 : vector<8x256xf32>, i32 -> vector<8x256xf32>
      %21 = arith.maximumf %19, %20 : vector<8x256xf32>
      %c240_i32 = arith.constant 240 : i32
      %22 = tpu.dynamic_rotate %21 by %c240_i32 dim 1 : vector<8x256xf32>, i32 -> vector<8x256xf32>
      %23 = arith.maximumf %21, %22 : vector<8x256xf32>
      %c0_9 = arith.constant 0 : index
      %c0_10 = arith.constant 0 : index
      %24 = vector.load %arg8[%c0_9, %c0_10] : memref<256x64xf32, #tpu.memory_space<vmem>>, vector<256x64xf32>
      %cst_11 = arith.constant dense<0.000000e+00> : vector<8x64xf32>
      %25 = tpu.matmul %23, %24, %cst_11 {dimension_numbers = #tpu.dot_dimension_numbers<[1], [0], [0], [1], [0, 0, 1, 1], [], []>} : vector<8x256xf32>, vector<256x64xf32>, vector<8x64xf32> -> vector<8x64xf32>
      %c0_12 = arith.constant 0 : index
      %c0_13 = arith.constant 0 : index
      %c0_14 = arith.constant 0 : index
      %26 = vector.load %arg9[%c0_12, %c0_13, %c0_14] : memref<1x8x64xf32, #tpu.memory_space<vmem>>, vector<1x8x64xf32>
      %27 = vector.shape_cast %26 : vector<1x8x64xf32> to vector<8x64xf32>
      %28 = vector.shape_cast %25 : vector<8x64xf32> to vector<1x8x64xf32>
      tpu.vector_store %arg9[%c0_12, %c0_13, %c0_14], %28 {strides = array<i32>} : memref<1x8x64xf32, #tpu.memory_space<vmem>>, vector<1x8x64xf32>,
    } else {
    }
    return
  }
  func.func @transform_0(%arg0: i32, %arg1: i32) -> (i32, i32, i32) {
    %c0_i32 = arith.constant 0 : i32
    %c0_i32_0 = arith.constant 0 : i32
    %c0_i32_1 = arith.constant 0 : i32
    return %arg1, %c0_i32, %c0_i32_0 : i32, i32, i32
  }
  func.func @transform_1(%arg0: i32, %arg1: i32) -> (i32, i32, i32) {
    %c0_i32 = arith.constant 0 : i32
    %c0_i32_0 = arith.constant 0 : i32
    %c0_i32_1 = arith.constant 0 : i32
    %c0_i32_2 = arith.constant 0 : i32
    return %c0_i32, %c0_i32_0, %c0_i32_1 : i32, i32, i32
  }
  func.func @transform_2(%arg0: i32, %arg1: i32) -> (i32, i32) {
    %c0_i32 = arith.constant 0 : i32
    %c0_i32_0 = arith.constant 0 : i32
    %c0_i32_1 = arith.constant 0 : i32
    return %c0_i32, %c0_i32_0 : i32, i32
  }
  func.func @transform_3(%arg0: i32, %arg1: i32) -> (i32, i32) {
    %c0_i32 = arith.constant 0 : i32
    %c0_i32_0 = arith.constant 0 : i32
    %c0_i32_1 = arith.constant 0 : i32
    return %c0_i32, %c0_i32_0 : i32, i32
  }
  func.func @transform_4(%arg0: i32, %arg1: i32) -> (i32, i32) {
    %c0_i32 = arith.constant 0 : i32
    %c0_i32_0 = arith.constant 0 : i32
    %c0_i32_1 = arith.constant 0 : i32
    return %c0_i32, %c0_i32_0 : i32, i32
  }
  func.func @transform_5(%arg0: i32, %arg1: i32) -> (i32, i32, i32) {
    %c0_i32 = arith.constant 0 : i32
    %c0_i32_0 = arith.constant 0 : i32
    %c0_i32_1 = arith.constant 0 : i32
    %c0_i32_2 = arith.constant 0 : i32
    return %c0_i32, %c0_i32_0, %c0_i32_1 : i32, i32, i32
  }
  func.func @transform_6(%arg0: i32, %arg1: i32) -> (i32, i32) {
    %c0_i32 = arith.constant 0 : i32
    %c0_i32_0 = arith.constant 0 : i32
    %c0_i32_1 = arith.constant 0 : i32
    return %c0_i32, %c0_i32_0 : i32, i32
  }
  func.func @transform_7(%arg0: i32, %arg1: i32) -> (i32, i32, i32) {
    %0 = arith.muli %arg1, %arg0 : i32
    %c0_i32 = arith.constant 0 : i32
    %c0_i32_0 = arith.constant 0 : i32
    %c0_i32_1 = arith.constant 0 : i32
    return %0, %c0_i32, %c0_i32_0 : i32, i32, i32
  }
}

</mosaic_0001>

<bundles_post_ra>
// kernel: conv_block_forward.1
= control target key start
LH: loop header
LB: loop body
LE: loop exit
PB: predicated region body
PF: predicated region fallthrough
CT: control target
= control target key end

     0   :  { %s1818_s24 = smov 0   ;;  %s1820_s25 = smov 0   ;;  %s2126_s0 = inlined_call_operand.vmem [shape: f32[2,4,256], index: 0, kind: input, shape index: {}]   ;;  %s2127_s1 = inlined_call_operand.vmem [shape: f32[9,8,4], index: 1, kind: input, shape index: {}]   ;;  %s2128_s2 = inlined_call_operand.vmem [shape: f32[8,1], index: 2, kind: input, shape index: {}]   ;;  %s2129_s3 = inlined_call_operand.vmem [shape: f32[8,1], index: 3, kind: input, shape index: {}]   ;;  %s2130_s4 = inlined_call_operand.vmem [shape: f32[8,1], index: 4, kind: input, shape index: {}]   ;;  %s2131_s5 = inlined_call_operand.vmem [shape: f32[9,1,256], index: 5, kind: input, shape index: {}]   ;;  %s2132_s6 = inlined_call_operand.vmem [shape: f32[256,64], index: 6, kind: input, shape index: {}]   ;;  %s2133_s7 = inlined_call_operand.vmem [shape: f32[2,8,64], index: 7, kind: output, shape index: {}]  }
   0x1   :  { %s1822_s26 = smov 0   ;;  %s1824_s27 = smov 0  }
   0x2   :  { %s1826_s28 = smov 0  }
   0x3 LB: > { %s26_s29 = sadd.s32 1, %s1754_s26  ;;  %s29_s30 = sadd.s32 1, %s1758_s27  ;;  %s1762_s28 = sphi %s1826_s28, %s17_s28   ;;  %s1758_s27 = sphi %s1824_s27, %s2137_s27   ;;  %s1754_s26 = sphi %s1822_s26, %s2136_s26   ;;  %s1750_s25 = sphi %s1820_s25, %s2135_s25   ;;  %s1746_s24 = sphi %s1818_s24, %s2134_s24  }
   0x4   : > { %p27_p0 = scmp.ge.s32.totalorder %s26_s29, 2  ;;  %p1513_p1 = scmp.ge.s32.totalorder %s1762_s28, 1 }
   0x5   : > { %p251_p2 = scmp.lt.s32.totalorder %s1762_s28, 5 }
   0x6   : > { %s2139_s29 = smov (%p27_p0, %s26_s29), 0  ;;  %s2141_s30 = smov (!%p27_p0, %s29_s30), %s1758_s27 }
   0x7   : > { %p252_p3 = pnand %p1513_p1, %p251_p2  ;;  %p31_p4 = scmp.ge.s32.totalorder %s2141_s30, 2 }
   0x8   : > { %p283_p5 = scmp.lt.s32.totalorder (!%p252_p3), %s1746_s24, 1  ;;  %s288_s8 = smul.u32 (!%p252_p3), %s1746_s24, %s1750_s25 }
   0x9   : > { %s2143_s30 = smov (%p31_p4, %s2141_s30), 0  ;;  %255 = sbr.rel (%p252_p3) target bundleno = 1184 (0x4a0), region = 48 }
   0xa   : > { %p289_p6 = scmp.lt.s32.totalorder (!%p252_p3), %s288_s8, 1  ;;  %p1517_p7 = scmp.ne.s32.totalorder (!%p252_p3), %s1750_s25, 0 }
  0x10   : > { %s284_s9 = scalar_select %p283_p5, %s1746_s24, 1 }
  0x11   : > { %s2145_s8 = smov (!%p289_p6, %s288_s8), 1  ;;  %297 = sbr.rel (%p1517_p7) target bundleno = 546 (0x222), region = 52 }
  0x12   : > { %s1569_s10 = sshll.u32 %s284_s9, 3  ;;  %s1516_s14 = sshll.u32 %s2145_s8, 3 }
  0x13   : > { %s287_s13 = scalar_lea.vmem %s2126_s0, %s1569_s10  ;;  %s1862_s17 = scalar_lea.vmem %s2133_s7, %s1516_s14 }
  0x14   : > { %p1518_p8 = scmp.ne.s32.totalorder (!%p1517_p7), %s1746_s24, 0 }
  0x18   : > { %301 = sbr.rel (%p1518_p8) target bundleno = 31 (0x1f), region = 56  ;;  %vm302_vm0 = vcmask (!%p1518_p8), 7168   ;;  %v1764_v0 = vmov (!%p1518_p8), 0.0  }
  0x19   : > { %303 = vst.msk [vmem:[#allocation3] sm:$0xff] (!%p1518_p8), %vm302_vm0, %v1764_v0  ;;  %304 = vst.msk [vmem:[#allocation4] sm:$0xff] (!%p1518_p8), %vm302_vm0, %v1764_v0 }
  0x1f PF: > { %v305_v1 = vld [vmem:[%s287_s13] sm:$0xff]  ;;  %vm361_vm1 = vcmask 1043456   ;;  %s1765_s18 = smov 127   ;;  %s1766_s19 = smov 16   ;;  %v1767_v3 = vmov 0.0   ;;  %vm357_vm2 = vcmask 31744   ;;  %v313_v7 = vlaneseq }
  0x20   : > { %813 = vrot.lane.b32.xlu1 %v305_v1, %s1765_s18  ;;  %333 = vrot.lane.b32.xlu0 %v305_v1, %s1766_s19  ;;  %v307_v2 = vcombine.high %v305_v1, %v305_v1  ;;  %v1537_v4 = vld [vmem:[%s2127_s1 + $0x20] sm:$0xff]  ;;  %s1768_s22 = smov 17   ;;  %s1769_s23 = smov 113   ;;  %v1772_v5 = vmov 0   ;;  %v1541_v12 = vld [vmem:[%s2131_s5 + $0xa] sm:$0x3] }
  0x21   : > { %804 = vmatprep.mubr.f32.mxu0 %v1767_v3  ;;  %432 = vmatprep.mubr.f32.mxu1 %v1767_v3  ;;  %s1770_s8 = smov 15   ;;  %s1771_s9 = smov 112   ;;  %v1237_v6 = vld [vmem:[%s2128_s2] sm:$0xff]  ;;  %v321_v8 = vshrl.u32 %v313_v7, 7  ;;  %v1878_v9 = vand.u32 127, %v313_v7  ;;  %v1520_v34 = vld [vmem:[%s2127_s1 + $0x8] sm:$0xff] }
  0x22   : > { %1538 = vmatprep.subr.msk.mxu0 %vm361_vm1, %v307_v2  ;;  %1709 = vset.pattern.permute.xlu0 %v1772_v5  ;;  %s1773_s10 = smov 1   ;;  %s1774_s11 = smov 111   ;;  %v1519_v13 = vld [vmem:[%s2131_s5 + $0x2] sm:$0x3]  ;;  %v318_v16 = vld [vmem:[%s2131_s5] sm:$0x3] }
  0x23   : > { %1539 = vmatpush1.msk.msra.mxu0 %vm361_vm1, %v305_v1  ;;  %v1880_v10 = vsub.s32 0, %v321_v8  ;;  %v1882_v11 = vsub.s32 1, %v321_v8  ;;  %vm817_vm3 = vcmp.lt.s32.totalorder %v1878_v9, 127  ;;  %vm337_vm4 = vcmp.lt.s32.totalorder %v1878_v9, 16  ;;  %v1546_v33 = vld [vmem:[%s2131_s5 + $0xc] sm:$0x3] }
  0x24   : > { %815 = vrot.lane.b32.xlu1 %v307_v2, %s1765_s18  ;;  %335 = vrot.lane.b32.xlu0 %v307_v2, %s1766_s19  ;;  %vm315_vm5 = vcmp.lt.s32.totalorder %v1878_v9, 17  ;;  %v1542_v35 = vld [vmem:[%s2127_s1 + $0x28] sm:$0xff]  ;;  %vm923_vm6 = vcmp.lt.s32.totalorder %v1878_v9, 113  ;;  %v1527_v44 = vld [vmem:[%s2131_s5 + $0x4] sm:$0x3]  ;;  %vm523_vm7 = vcmp.lt.s32.totalorder %v1878_v9, 15 }
  0x25   : > { %1540 = vmatmul.mubr.msk.f32.vlgmr.msra.gmra.mrb[0].mxu0 %vm357_vm2, %v1537_v4  ;;  %v826_v17 = vrot.slane %v1541_v12, %v1880_v10  ;;  %v830_v18 = vrot.slane %v1541_v12, %v1882_v11  ;;  %v346_v19 = vrot.slane %v1519_v13, %v1880_v10  ;;  %v350_v20 = vrot.slane %v1519_v13, %v1882_v11  ;;  %v1551_v53 = vld [vmem:[%s2131_s5 + $0xe] sm:$0x3]  ;;  %v332_v54 = vld [vmem:[%s2127_s1] sm:$0xff]  ;;  %v1547_v55 = vld [vmem:[%s2127_s1 + $0x30] sm:$0xff]  ;;  %s1570_s16 = sshll.u32 %s1746_s24, 4 }
  0x26   : > { %910 = vmatprep.mubr.f32.mxu0 %v1767_v3  ;;  %v323_v23 = vrot.slane %v318_v16, %v1880_v10  ;;  %v327_v24 = vrot.slane %v318_v16, %v1882_v11  ;;  %v932_v40 = vrot.slane %v1546_v33, %v1880_v10  ;;  %v936_v43 = vrot.slane %v1546_v33, %v1882_v11  ;;  %v1532_v0 = vld [vmem:[%s2131_s5 + $0x6] sm:$0x3]  ;;  %v1556_v13 = vld [vmem:[%s2131_s5 + $0x10] sm:$0x3]  ;;  %s1247_s18 = scalar_lea.vmem [#allocation2], %s1570_s16 }
  0x27   : > { %v532_v51 = vrot.slane %v1527_v44, %v1880_v10  ;;  %v536_v52 = vrot.slane %v1527_v44, %v1882_v11  ;;  %v1038_v60 = vrot.slane %v1551_v53, %v1880_v10  ;;  %vm1029_vm8 = vcmp.lt.s32.totalorder %v1878_v9, 112 }
  0x28   : > { %311 = vrot.lane.b32.xlu1 %v307_v2, %s1768_s22  ;;  %309 = vrot.lane.b32.xlu0 %v305_v1, %s1768_s22  ;;  %v1042_v63 = vrot.slane %v1551_v53, %v1882_v11  ;;  %vm629_vm9 = vcmp.lt.s32.totalorder %v1878_v9, 1  ;;  %v638_v8 = vrot.slane %v1532_v0, %v1880_v10  ;;  %v642_v12 = vrot.slane %v1532_v0, %v1882_v11 }
  0x29   : > { %vm1135_vm10 = vcmp.lt.s32.totalorder %v1878_v9, 111  ;;  %v1533_v9 = vld [vmem:[%s2127_s1 + $0x18] sm:$0xff]  ;;  %vm1255_vm11 = vcmask 7168  }
  0x2c   : > { %921 = vrot.lane.b32.xlu1 %v307_v2, %s1769_s23  ;;  %919 = vrot.lane.b32.xlu0 %v305_v1, %s1769_s23 }
  0x30   : > { %521 = vrot.lane.b32.xlu1 %v307_v2, %s1770_s8  ;;  %519 = vrot.lane.b32.xlu0 %v305_v1, %s1770_s8 }
  0x34   : > { %1027 = vrot.lane.b32.xlu1 %v307_v2, %s1771_s9  ;;  %1025 = vrot.lane.b32.xlu0 %v305_v1, %s1771_s9 }
  0x38   : > { %627 = vrot.lane.b32.xlu1 %v307_v2, %s1773_s10  ;;  %625 = vrot.lane.b32.xlu0 %v305_v1, %s1773_s10 }
  0x3c   : > { %1133 = vrot.lane.b32.xlu1 %v307_v2, %s1774_s11  ;;  %1131 = vrot.lane.b32.xlu0 %v305_v1, %s1774_s11 }
  0x40   : > { %1240 = vperm.xlu0 %1709, %v1237_v6  }
  0x92   : > { %v814_v14 = vpop.permute.xlu1 %813  ;;  %v334_v15 = vpop.permute.xlu0 %333 }
  0x96   : > { %v816_v21 = vpop.permute.xlu1 %815  ;;  %v336_v22 = vpop.permute.xlu0 %335 }
  0x97   : > { %v818_v25 = vsel %vm817_vm3, %v814_v14, %v816_v21  ;;  %v819_v26 = vsel %vm817_vm3, %v816_v21, %v814_v14  ;;  %v338_v27 = vsel %vm337_vm4, %v334_v15, %v336_v22  ;;  %v339_v28 = vsel %vm337_vm4, %v336_v22, %v334_v15  ;;  %v1528_v14 = vld [vmem:[%s2127_s1 + $0x10] sm:$0xff]  ;;  %v1552_v15 = vld [vmem:[%s2127_s1 + $0x38] sm:$0xff] }
  0x98   : > { %v833_v29 = vmul.f32 %v826_v17, %v818_v25  ;;  %v834_v30 = vmul.f32 %v830_v18, %v819_v26  ;;  %v353_v31 = vmul.f32 %v346_v19, %v339_v28  ;;  %v354_v32 = vmul.f32 %v350_v20, %v338_v27 }
  0x99   : > { %v1144_v20 = vrot.slane %v1556_v13, %v1880_v10 }
  0x9a   : > { %v312_v36 = vpop.permute.xlu1 %311  ;;  %1521 = vmatprep.subr.msk.mxu1 %vm361_vm1, %v354_v32  ;;  %v310_v37 = vpop.permute.xlu0 %309  ;;  %1543 = vmatprep.subr.msk.mxu0 %vm361_vm1, %v834_v30 }
  0x9b   : > { %v316_v38 = vsel %vm315_vm5, %v310_v37, %v312_v36  ;;  %v317_v39 = vsel %vm315_vm5, %v312_v36, %v310_v37  ;;  %1522 = vmatpush1.msk.msra.mxu1 %vm361_vm1, %v353_v31  ;;  %1544 = vmatpush1.msk.msra.mxu0 %vm361_vm1, %v833_v29 }
  0x9c   : > { %v330_v41 = vmul.f32 %v323_v23, %v317_v39  ;;  %v331_v42 = vmul.f32 %v327_v24, %v316_v38  ;;  %1523 = vmatmul.mubr.msk.f32.vlgmr.msra.gmra.mrb[0].mxu1 %vm357_vm2, %v1520_v34  ;;  %1545 = vmatmul.mubr.msk.f32.vlgmr.msra.gmra.mrb[0].mxu0 %vm357_vm2, %v1542_v35  ;;  %v1148_v23 = vrot.slane %v1556_v13, %v1882_v11  ;;  %v1557_v11 = vld [vmem:[%s2127_s1 + $0x40] sm:$0xff] }
  0x9d   : > { %512 = vmatprep.mubr.f32.mxu1 %v1767_v3  ;;  %1016 = vmatprep.mubr.f32.mxu0 %v1767_v3 }
  0x9e   : > { %v922_v45 = vpop.permute.xlu1 %921  ;;  %1524 = vmatprep.subr.msk.mxu1 %vm361_vm1, %v331_v42  ;;  %v920_v46 = vpop.permute.xlu0 %919 }
  0x9f   : > { %v924_v47 = vsel %vm923_vm6, %v920_v46, %v922_v45  ;;  %v925_v48 = vsel %vm923_vm6, %v922_v45, %v920_v46  ;;  %1525 = vmatpush1.msk.msra.mxu1 %vm361_vm1, %v330_v41  ;;  %v1250_v41 = vld [vmem:[#allocation3] sm:$0xff] }
  0xa0   : > { %v939_v49 = vmul.f32 %v932_v40, %v924_v47  ;;  %v940_v50 = vmul.f32 %v936_v43, %v925_v48  ;;  %v1257_v43 = vld [vmem:[#allocation4] sm:$0xff] }
  0xa2   : > { %v522_v56 = vpop.permute.xlu1 %521  ;;  %v520_v57 = vpop.permute.xlu0 %519  ;;  %1548 = vmatprep.subr.msk.mxu0 %vm361_vm1, %v940_v50 }
  0xa3   : > { %v524_v58 = vsel %vm523_vm7, %v520_v57, %v522_v56  ;;  %v525_v59 = vsel %vm523_vm7, %v522_v56, %v520_v57  ;;  %1549 = vmatpush1.msk.msra.mxu0 %vm361_vm1, %v939_v49 }
  0xa4   : > { %v539_v61 = vmul.f32 %v532_v51, %v525_v59  ;;  %v540_v62 = vmul.f32 %v536_v52, %v524_v58  ;;  %1526 = vmatmul.mubr.msk.f32.vlgmr.msra.gmra.mrb[0].mxu1 %vm357_vm2, %v332_v54  ;;  %1550 = vmatmul.mubr.msk.f32.vlgmr.msra.gmra.mrb[0].mxu0 %vm357_vm2, %v1547_v55 }
  0xa5   : > { %616 = vmatprep.mubr.f32.mxu1 %v1767_v3  ;;  %1122 = vmatprep.mubr.f32.mxu0 %v1767_v3 }
  0xa6   : > { %v1028_v1 = vpop.permute.xlu1 %1027  ;;  %1529 = vmatprep.subr.msk.mxu1 %vm361_vm1, %v540_v62  ;;  %v1026_v2 = vpop.permute.xlu0 %1025 }
  0xa7   : > { %v1030_v4 = vsel %vm1029_vm8, %v1026_v2, %v1028_v1  ;;  %v1031_v5 = vsel %vm1029_vm8, %v1028_v1, %v1026_v2  ;;  %1530 = vmatpush1.msk.msra.mxu1 %vm361_vm1, %v539_v61 }
  0xa8   : > { %v1045_v6 = vmul.f32 %v1038_v60, %v1030_v4  ;;  %v1046_v7 = vmul.f32 %v1042_v63, %v1031_v5 }
  0xaa   : > { %v628_v16 = vpop.permute.xlu1 %627  ;;  %v626_v17 = vpop.permute.xlu0 %625  ;;  %1553 = vmatprep.subr.msk.mxu0 %vm361_vm1, %v1046_v7 }
  0xab   : > { %v630_v18 = vsel %vm629_vm9, %v626_v17, %v628_v16  ;;  %v631_v19 = vsel %vm629_vm9, %v628_v16, %v626_v17  ;;  %1554 = vmatpush1.msk.msra.mxu0 %vm361_vm1, %v1045_v6 }
  0xac   : > { %v645_v21 = vmul.f32 %v638_v8, %v631_v19  ;;  %v646_v22 = vmul.f32 %v642_v12, %v630_v18  ;;  %1531 = vmatmul.mubr.msk.f32.vlgmr.msra.gmra.mrb[0].mxu1 %vm357_vm2, %v1528_v14  ;;  %1555 = vmatmul.mubr.msk.f32.vlgmr.msra.gmra.mrb[0].mxu0 %vm357_vm2, %v1552_v15 }
  0xad   : > { %722 = vmatprep.mubr.f32.mxu1 %v1767_v3  ;;  %1228 = vmatprep.mubr.f32.mxu0 %v1767_v3 }
  0xae   : > { %v1134_v24 = vpop.permute.xlu1 %1133  ;;  %1534 = vmatprep.subr.msk.mxu1 %vm361_vm1, %v646_v22  ;;  %v1132_v25 = vpop.permute.xlu0 %1131 }
  0xaf   : > { %v1136_v10 = vsel %vm1135_vm10, %v1132_v25, %v1134_v24  ;;  %v1137_v26 = vsel %vm1135_vm10, %v1134_v24, %v1132_v25  ;;  %1535 = vmatpush1.msk.msra.mxu1 %vm361_vm1, %v645_v21 }
  0xb0   : > { %v1151_v27 = vmul.f32 %v1144_v20, %v1136_v10  ;;  %v1152_v28 = vmul.f32 %v1148_v23, %v1137_v26 }
  0xb2   : > { %1558 = vmatprep.subr.msk.mxu0 %vm361_vm1, %v1152_v28 }
  0xb3   : > { %1559 = vmatpush1.msk.msra.mxu0 %vm361_vm1, %v1151_v27 }
  0xb4   : > { %1536 = vmatmul.mubr.msk.f32.vlgmr.msra.gmra.mrb[0].mxu1 %vm357_vm2, %v1533_v9  ;;  %1560 = vmatmul.mubr.msk.f32.vlgmr.msra.gmra.mrb[0].mxu0 %vm357_vm2, %v1557_v11 }
  0xbf   : > { %v1241_v3 = vpop.permute.xlu0 %1240 }
 0x187   : > { %v724_v29 = vpop.f32.mrb[0].mxu1  ;;  %v1230_v30 = vpop.f32.mrb[0].mxu0 }
 0x188   : > { %v1639_v31 = vadd.f32 %v1230_v30, %v724_v29  ;;  %v726_v32 = vpop.f32.mrb[1].mxu1  ;;  %v1232_v33 = vpop.f32.mrb[1].mxu0 }
 0x189   : > { %v1640_v34 = vadd.f32 %v1232_v33, %v726_v32 }
 0x18a   : > { %v1243_v35 = vadd.f32 %v1639_v31, %v1241_v3 }
 0x18b   : > { %v1244_v36 = vadd.f32 %v1640_v34, %v1241_v3 }
 0x18c   : > { %1248 = vst [vmem:[%s1247_s18] sm:$0xff] %v1243_v35  ;;  %v1258_v37 = vmul.f32 %v1243_v35, %v1243_v35 }
 0x18d   : > { %1249 = vst [vmem:[%s1247_s18 + $0x8] sm:$0xff] %v1244_v36  ;;  %v1251_v38 = vadd.f32 %v1244_v36, %v1243_v35  ;;  %v1259_v39 = vmul.f32 %v1244_v36, %v1244_v36 }
 0x18f   : > { %1252 = vadd.xlane.f32.xlu1 %v1251_v38  ;;  %v1260_v40 = vadd.f32 %v1259_v39, %v1258_v37 }
 0x191   : > { %1261 = vadd.xlane.f32.xlu0 %v1260_v40 }
 0x21c   : > { %v1253_v42 = vpop.xlane.xlu1 %1252 }
 0x21d   : > { %v1254_v44 = vadd.f32 %v1253_v42, %v1250_v41 }
 0x21e   : > { %v1262_v45 = vpop.xlane.xlu0 %1261 }
 0x21f   : > { %1256 = vst.msk [vmem:[#allocation3] sm:$0xff] %vm1255_vm11, %v1254_v44  ;;  %v1263_v46 = vadd.f32 %v1262_v45, %v1257_v43 }
 0x221   : > { %1264 = vst.msk [vmem:[#allocation4] sm:$0xff] %vm1255_vm11, %v1263_v46 }
 0x222 PF: > { %p1563_p9 = scmp.ne.s32.totalorder %s1750_s25, 1 }
 0x223   : > { %p1564_p10 = scmp.ne.s32.totalorder (!%p1563_p9), %s1746_s24, 0 }
 0x224   : > { %1268 = sbr.rel (%p1563_p9) target bundleno = 1184 (0x4a0), region = 60 }
 0x22b   : > { %1272 = sbr.rel (%p1564_p10) target bundleno = 584 (0x248), region = 64  ;;  %v1273_v47 = vld [vmem:[#allocation3] sm:$0xff] (!%p1564_p10)  ;;  %v1275_v48 = vld [vmem:[#allocation4] sm:$0xff] (!%p1564_p10)  ;;  %vm1284_vm12 = vcmask (!%p1564_p10), 7168  }
 0x22c   : > { %v1274_v49 = vmul.f32 (!%p1564_p10), 0.001953125, %v1273_v47  ;;  %v1276_v50 = vmul.f32 (!%p1564_p10), 0.001953125, %v1275_v48  ;;  %v1280_v55 = vld [vmem:[%s2129_s3] sm:$0xff] (!%p1564_p10) }
 0x22d   : > { %v1286_v58 = vld [vmem:[%s2130_s4] sm:$0xff] (!%p1564_p10) }
 0x22e   : > { %v1277_v51 = vmul.f32 (!%p1564_p10), %v1274_v49, %v1274_v49 }
 0x230   : > { %v1278_v52 = vsub.f32 (!%p1564_p10), %v1276_v50, %v1277_v51 }
 0x232   : > { %v1279_v53 = vmax.f32 %v1278_v52, 0.0 }
 0x234   : > { %v1281_v54 = vadd.f32 1e-05, %v1279_v53 }
 0x236   : > { %1711 = vrsqrt.f32 %v1281_v54 }
 0x240   : > { %v1712_v56 = vpop.eup %1711 }
 0x241   : > { %v1283_v57 = vmul.f32 %v1712_v56, %v1280_v55 }
 0x243   : > { %1285 = vst.msk [vmem:[#allocation5] sm:$0xff] %vm1284_vm12, %v1283_v57  ;;  %v1287_v59 = vmul.f32 %v1283_v57, %v1274_v49 }
 0x245   : > { %v1288_v60 = vsub.f32 %v1286_v58, %v1287_v59 }
 0x247   : > { %1289 = vst.msk [vmem:[#allocation6] sm:$0xff] %vm1284_vm12, %v1288_v60 }
 0x248 PF: > { %v1775_v62 = vmov 0   ;;  %s1571_s22 = sshll.u32 %s1746_s24, 4  ;;  %v1349_v12 = vld [vmem:[%s2132_s6 + $0x80] sm:$0xff]  ;;  %v1350_v13 = vld [vmem:[%s2132_s6 + $0x88] sm:$0xff]  ;;  %v1351_v17 = vld [vmem:[%s2132_s6 + $0x90] sm:$0xff]  ;;  %s1776_s14 = smov 127   ;;  %v1317_v53 = vlaneseq }
 0x249   : > { %1713 = vset.pattern.permute.xlu0 %v1775_v62  ;;  %s1292_s23 = scalar_lea.vmem [#allocation2], %s1571_s22  ;;  %v1333_v14 = vld [vmem:[%s2132_s6] sm:$0xff]  ;;  %v1607_v15 = vpack.c.bf16 %v1350_v13, %v1349_v12  ;;  %v1334_v16 = vld [vmem:[%s2132_s6 + $0x8] sm:$0xff]  ;;  %v1352_v18 = vld [vmem:[%s2132_s6 + $0x98] sm:$0xff]  ;;  %s1777_s21 = smov 112   ;;  %vm1435_vm15 = vcmask 523264  }
 0x24a   : > { %v1295_v61 = vld [vmem:[#allocation5] sm:$0xff]  ;;  %v1293_v1 = vld [vmem:[%s1292_s23] sm:$0xff]  ;;  %v1294_v2 = vld [vmem:[%s1292_s23 + $0x8] sm:$0xff]  ;;  %v1609_v21 = vpack.c.bf16 %v1334_v16, %v1333_v14  ;;  %v1611_v22 = vpack.c.bf16 %v1352_v18, %v1351_v17  ;;  %v1318_v59 = vand.u32 127, %v1317_v53 }
 0x24b   : > { %1298 = vperm.xlu0 %1713, %v1295_v61   ;;  %v1335_v23 = vld [vmem:[%s2132_s6 + $0x10] sm:$0xff]  ;;  %v1336_v24 = vld [vmem:[%s2132_s6 + $0x18] sm:$0xff]  ;;  %v1353_v25 = vld [vmem:[%s2132_s6 + $0xa0] sm:$0xff]  ;;  %1608 = vmatprep.subr.bf16.mxu0 %v1607_v15 }
 0x24c   : > { %v1354_v10 = vld [vmem:[%s2132_s6 + $0xa8] sm:$0xff]  ;;  %1610 = vmatpush3.bf16.msra.mxu0 %v1609_v21  ;;  %v1613_v27 = vpack.c.bf16 %v1336_v24, %v1335_v23  ;;  %v1337_v9 = vld [vmem:[%s2132_s6 + $0x20] sm:$0xff]  ;;  %v1355_v3 = vld [vmem:[%s2132_s6 + $0xb0] sm:$0xff]  ;;  %vm1319_vm13 = vcmp.lt.s32.totalorder %v1318_v59, 127  ;;  %vm1328_vm14 = vcmp.lt.s32.totalorder %v1318_v59, 112 }
 0x24d   : > { %1612 = vmatprep.subr.bf16.mxu0 %v1611_v22  ;;  %v1615_v28 = vpack.c.bf16 %v1354_v10, %v1353_v25  ;;  %v1338_v11 = vld [vmem:[%s2132_s6 + $0x28] sm:$0xff]  ;;  %v1356_v29 = vld [vmem:[%s2132_s6 + $0xb8] sm:$0xff]  ;;  %v1339_v32 = vld [vmem:[%s2132_s6 + $0x30] sm:$0xff] }
 0x24e   : > { %v1303_v63 = vld [vmem:[#allocation6] sm:$0xff]  ;;  %v1617_v30 = vpack.c.bf16 %v1338_v11, %v1337_v9  ;;  %v1619_v31 = vpack.c.bf16 %v1356_v29, %v1355_v3  ;;  %v1357_v34 = vld [vmem:[%s2132_s6 + $0xc0] sm:$0xff]  ;;  %v1358_v35 = vld [vmem:[%s2132_s6 + $0xc8] sm:$0xff] }
 0x24f   : > { %1306 = vperm.xlu0 %1713, %v1303_v63   ;;  %v1340_v33 = vld [vmem:[%s2132_s6 + $0x38] sm:$0xff]  ;;  %v1623_v37 = vpack.c.bf16 %v1358_v35, %v1357_v34  ;;  %v1341_v38 = vld [vmem:[%s2132_s6 + $0x40] sm:$0xff]  ;;  %v1342_v39 = vld [vmem:[%s2132_s6 + $0x48] sm:$0xff] }
 0x250   : > { %1614 = vmatpush3.bf16.msra.mxu0 %v1613_v27  ;;  %v1621_v36 = vpack.c.bf16 %v1340_v33, %v1339_v32  ;;  %v1359_v40 = vld [vmem:[%s2132_s6 + $0xd0] sm:$0xff]  ;;  %v1360_v41 = vld [vmem:[%s2132_s6 + $0xd8] sm:$0xff]  ;;  %v1625_v42 = vpack.c.bf16 %v1342_v39, %v1341_v38  ;;  %v1361_v46 = vld [vmem:[%s2132_s6 + $0xe0] sm:$0xff] }
 0x251   : > { %1616 = vmatprep.subr.bf16.mxu0 %v1615_v28  ;;  %v1627_v43 = vpack.c.bf16 %v1360_v41, %v1359_v40  ;;  %v1343_v44 = vld [vmem:[%s2132_s6 + $0x50] sm:$0xff]  ;;  %v1344_v45 = vld [vmem:[%s2132_s6 + $0x58] sm:$0xff]  ;;  %v1362_v47 = vld [vmem:[%s2132_s6 + $0xe8] sm:$0xff] }
 0x252   : > { %v1629_v48 = vpack.c.bf16 %v1344_v45, %v1343_v44  ;;  %v1631_v49 = vpack.c.bf16 %v1362_v47, %v1361_v46  ;;  %v1345_v50 = vld [vmem:[%s2132_s6 + $0x60] sm:$0xff]  ;;  %v1346_v51 = vld [vmem:[%s2132_s6 + $0x68] sm:$0xff]  ;;  %v1363_v54 = vld [vmem:[%s2132_s6 + $0xf0] sm:$0xff] }
 0x253   : > { %v1633_v52 = vpack.c.bf16 %v1346_v51, %v1345_v50  ;;  %v1364_v55 = vld [vmem:[%s2132_s6 + $0xf8] sm:$0xff]  ;;  %v1347_v57 = vld [vmem:[%s2132_s6 + $0x70] sm:$0xff] }
 0x254   : > { %1618 = vmatpush3.bf16.msra.mxu0 %v1617_v30  ;;  %v1635_v56 = vpack.c.bf16 %v1364_v55, %v1363_v54  ;;  %v1348_v58 = vld [vmem:[%s2132_s6 + $0x78] sm:$0xff] }
 0x255   : > { %1620 = vmatprep.subr.bf16.mxu0 %v1619_v31  ;;  %v1637_v60 = vpack.c.bf16 %v1348_v58, %v1347_v57 }
 0x258   : > { %1622 = vmatpush3.bf16.msra.mxu0 %v1621_v36 }
 0x259   : > { %1624 = vmatprep.subr.bf16.mxu0 %v1623_v37 }
 0x25c   : > { %1626 = vmatpush3.bf16.msra.mxu0 %v1625_v42 }
 0x25d   : > { %1628 = vmatprep.subr.bf16.mxu0 %v1627_v43 }
 0x260   : > { %1630 = vmatpush3.bf16.msra.mxu0 %v1629_v48 }
 0x261   : > { %1632 = vmatprep.subr.bf16.mxu0 %v1631_v49 }
 0x264   : > { %1634 = vmatpush3.bf16.msra.mxu0 %v1633_v52 }
 0x265   : > { %1636 = vmatprep.subr.bf16.mxu0 %v1635_v56 }
 0x268   : > { %1638 = vmatpush3.bf16.msra.mxu0 %v1637_v60 }
 0x2ca   : > { %v1299_v0 = vpop.permute.xlu0 %1298 }
 0x2cb   : > { %v1301_v4 = vmul.f32 %v1299_v0, %v1293_v1  ;;  %v1302_v5 = vmul.f32 %v1299_v0, %v1294_v2 }
 0x2ce   : > { %v1307_v6 = vpop.permute.xlu0 %1306 }
 0x2cf   : > { %v2000_v7 = vadd.f32 %v1307_v6, %v1301_v4  ;;  %v2002_v8 = vadd.f32 %v1307_v6, %v1302_v5 }
 0x2d1   : > { %v1311_v19 = vmax.f32 %v2000_v7, 0.0  ;;  %v1312_v20 = vmax.f32 %v2002_v8, 0.0 }
 0x2d3   : > { %v1714_v26 = vpack.i.bf16 %v1312_v20, %v1311_v19 }
 0x2d5   : > { %1715 = vrot.lane.b32.xlu1 %v1714_v26, %s1776_s14 }
 0x347   : > { %v1716_v61 = vpop.permute.xlu1 %1715 }
 0x348   : > { %v1718_v62 = vunpack.i.h.bf16 %v1716_v61  ;;  %v1717_v63 = vunpack.i.l.bf16 %v1716_v61 }
 0x34a   : > { %v1320_v0 = vsel %vm1319_vm13, %v1717_v63, %v1718_v62  ;;  %v1321_v1 = vsel %vm1319_vm13, %v1718_v62, %v1717_v63 }
 0x34b   : > { %v1322_v2 = vmax.f32 %v1311_v19, %v1320_v0  ;;  %v1323_v4 = vmax.f32 %v1312_v20, %v1321_v1 }
 0x34d   : > { %v1719_v5 = vpack.i.bf16 %v1323_v4, %v1322_v2 }
 0x34f   : > { %1720 = vrot.lane.b32.xlu1 %v1719_v5, %s1777_s21 }
 0x3c1   : > { %v1721_v6 = vpop.permute.xlu1 %1720 }
 0x3c2   : > { %v1723_v12 = vunpack.i.h.bf16 %v1721_v6  ;;  %v1722_v13 = vunpack.i.l.bf16 %v1721_v6 }
 0x3c4   : > { %v1330_v14 = vsel %vm1328_vm14, %v1723_v12, %v1722_v13  ;;  %v1329_v15 = vsel %vm1328_vm14, %v1722_v13, %v1723_v12 }
 0x3c5   : > { %v1332_v16 = vmax.f32 %v1323_v4, %v1330_v14  ;;  %v1331_v17 = vmax.f32 %v1322_v2, %v1329_v15 }
 0x3c7   : > { %1429 = vmatprep.mubr.f32.mxu0 %v1332_v16 }
 0x3c8   : > { %1430 = vmatmul.mubr.f32.vlgmr.msra.gmra.mrb[0].mxu0 %v1331_v17 }
 0x49b   : > { %v1604_v18 = vpop.f32.mrb[0].mxu0 }
 0x49c   : > { %v1605_v7 = vpop.f32.mrb[1].mxu0 }
 0x49d   : > { %v1606_v19 = vadd.f32 %v1605_v7, %v1604_v18 }
 0x49f   : > { %1436 = vst.msk [vmem:[%s1862_s17] sm:$0xff] %vm1435_vm15, %v1606_v19 }
 0x4a0 PF: > { %s17_s28 = sadd.s32 1, %s1762_s28   ;;  %s2134_s24 = smov %s1754_s26 }
 0x4a1   : > { %p14_p11 = scmp.ge.s32.totalorder %s17_s28, 6   ;;  %s2135_s25 = smov %s1758_s27 }
 0x4a2   : > { %s2136_s26 = smov %s2139_s29  ;;  %s2137_s27 = smov %s2143_s30 }
 0x4a3   :  { %16 = sbr.rel (!%p14_p11) target bundleno = 3 (0x3), region = 111 }

</bundles_post_ra>
